<compile_context>
chip_gen: v7x
topology: tpu7x:2x2x1
jax: 0.10.0
libtpu: 0.0.40
codegen_flags: <defaults>
</compile_context>

<pallas_src>
import functools
import math

import jax
import jax.numpy as jnp
from jax.experimental import pallas as pl
from jax.experimental.pallas import tpu as pltpu


def _sa_module_kernel(gamma_ref, x_ref, w1_ref, w2t_ref, o_ref, *, tb, emb, compute_dtype):
    g1 = gamma_ref[0]
    g2 = gamma_ref[1]

    x_f32 = x_ref[...]                                  # (S, TB*E) float32 batch tile
    x_c = x_f32.astype(compute_dtype)
    w1 = w1_ref[...].astype(compute_dtype)              # (S, S)
    w2t = w2t_ref[...].astype(compute_dtype)            # (E, E) = W2^T (pre-transposed)

    # Stage-1 shared-weight 1x1 conv for ALL TB batch elements in one lane-dense
    # MXU matmul: (S, S) @ (S, TB*E) -> (S, TB*E), f32 accumulation.
    convx = jnp.dot(w1, x_c, preferred_element_type=jnp.float32)

    outs = []
    for b in range(tb):                                 # static unroll over the batch tile
        lo = b * emb
        hi = lo + emb
        x_b = x_f32[:, lo:hi]                           # (S, E) f32 (residual path)
        xc_b = x_c[:, lo:hi]                            # (S, E) compute dtype
        # Single explicit transpose per batch element, reused by BOTH Gram matrices.
        xt_b = x_b.T.astype(compute_dtype)              # (E, S)

        # h = g1 * (x x^T) (W1 x) + x
        gram1 = jnp.dot(xc_b, xt_b, preferred_element_type=jnp.float32)          # (S, S)
        h = g1 * jnp.dot(gram1.astype(compute_dtype),
                         convx[:, lo:hi].astype(compute_dtype),
                         preferred_element_type=jnp.float32) + x_b               # (S, E) f32

        # out = g2 * (h W2^T) (x^T h) + h     (== sa_cross(h^T, x^T)^T)
        h_c = h.astype(compute_dtype)
        convh_t = jnp.dot(h_c, w2t, preferred_element_type=jnp.float32)          # (S, E)
        gram2 = jnp.dot(xt_b, h_c, preferred_element_type=jnp.float32)           # (E, E)
        o_b = g2 * jnp.dot(convh_t.astype(compute_dtype),
                           gram2.astype(compute_dtype),
                           preferred_element_type=jnp.float32) + h               # (S, E) f32
        outs.append(o_b)

    # Single lane-dense store of the whole (S, TB*E) output slab.
    o_ref[...] = jnp.concatenate(outs, axis=1).astype(o_ref.dtype)


def _pick_batch_tile(batch, seq, emb, vmem_budget_bytes=8 * 1024 * 1024):
    """Batch elements per grid step: as many as fit a conservative VMEM budget."""
    # f32 working set per batch element (x, conv, h, out, two Gram matrices) x2 for
    # compute-dtype copies / headroom.
    per_b = 2 * (6 * seq * emb + seq * seq + emb * emb) * 4
    tb = max(1, min(batch, vmem_budget_bytes // max(per_b, 1)))
    if tb >= batch:
        return batch
    # A partial block over the fused (batch*emb) lane axis must be a multiple of 128
    # lanes to keep stores unmasked and satisfy the (8, 128) rule.
    step = 128 // math.gcd(128, emb)
    tb = max(step, (tb // step) * step)
    return min(tb, batch)


def self_attention_module(x, w1, w2, gammas, *, compute_dtype=jnp.bfloat16, batch_tile=None):
    """x: (B, S, E) float32; w1: (S, S); w2: (E, E); gammas: (2,) float32."""
    batch, seq, emb = x.shape
    tb = batch_tile if batch_tile is not None else _pick_batch_tile(batch, seq, emb)
    n_tiles = int(pl.cdiv(batch, tb))
    b_pad = tb * n_tiles
    if b_pad != batch:
        # Zero-pad the batch; each batch element is independent, padded rows are dropped.
        x = jnp.pad(x, ((0, b_pad - batch), (0, 0), (0, 0)))

    # Fuse the batch axis into the lane axis: (B, S, E) -> (S, B*E).  Pure layout
    # plumbing in the wrapper that makes the kernel's working slab and stores lane-dense.
    x_fused = jnp.transpose(x, (1, 0, 2)).reshape(seq, b_pad * emb)
    w2t = w2.T                                          # fold sa_cross' conv transpose here

    lanes = tb * emb
    kernel = functools.partial(_sa_module_kernel, tb=tb, emb=emb,
                               compute_dtype=compute_dtype)

    # Advisory scheduling / VMEM hints.
    flops = 6 * b_pad * seq * emb * (seq + emb)
    bytes_accessed = 4 * (2 * b_pad * seq * emb + seq * seq + emb * emb + 2)
    cost = pl.CostEstimate(flops=flops, transcendentals=0, bytes_accessed=bytes_accessed)
    est_vmem = 4 * (2 * 2 * seq * lanes                              # in/out blocks, 2x buffered
                    + seq * seq + emb * emb                          # resident weights
                    + tb * (6 * seq * emb + seq * seq + emb * emb))  # live intermediates
    vmem_limit = int(min(max(4 * est_vmem, 16 * 1024 * 1024), 64 * 1024 * 1024))

    out_fused = pl.pallas_call(
        kernel,
        out_shape=jax.ShapeDtypeStruct((seq, b_pad * emb), x.dtype),
        grid=(n_tiles,),
        in_specs=[
            pl.BlockSpec(memory_space=pltpu.MemorySpace.SMEM),       # gammas (2,) scalars
            pl.BlockSpec((seq, lanes), lambda i: (0, i)),            # fused x batch tile
            pl.BlockSpec((seq, seq), lambda i: (0, 0)),              # W1   (whole, resident)
            pl.BlockSpec((emb, emb), lambda i: (0, 0)),              # W2^T (whole, resident)
        ],
        out_specs=pl.BlockSpec((seq, lanes), lambda i: (0, i)),
        compiler_params=pltpu.CompilerParams(
            dimension_semantics=("parallel",),
            vmem_limit_bytes=vmem_limit,
        ),
        cost_estimate=cost,
    )(gammas, x_fused, w1, w2t)

    # Undo the layout plumbing and drop batch padding.
    out = out_fused.reshape(seq, b_pad, emb).transpose(1, 0, 2)
    return out[:batch]


def reference(x, w1, w2, gammas, compute_dtype=jnp.float32):
    """Pure-JAX mirror of the PyTorch forward (eval mode), with optional mirrored
    bf16 MXU-operand casting (f32 accumulation, f32 residuals) for comparison."""
    f32 = jnp.float32
    cd = compute_dtype
    g1, g2 = gammas[0], gammas[1]
    xc, w1c, w2c = x.astype(cd), w1.astype(cd), w2.astype(cd)
    # sa_x on (B, S, E): channels = S
    convx = jnp.einsum('ij,bje->bie', w1c, xc, preferred_element_type=f32)
    xxT = jnp.einsum('bie,bje->bij', xc, xc, preferred_element_type=f32)
    h = g1 * jnp.einsum('bij,bje->bie', xxT.astype(cd), convx.astype(cd),
                        preferred_element_type=f32) + x
    # permute, sa_cross on (B, E, S): channels = E, key = x^T
    hx = jnp.swapaxes(h, 1, 2)                   # (B, E, S) f32
    xp = jnp.swapaxes(x, 1, 2).astype(cd)        # (B, E, S)
    convh = jnp.einsum('ef,bfs->bes', w2c, hx.astype(cd), preferred_element_type=f32)
    hxT = jnp.einsum('bes,bfs->bef', hx.astype(cd), xp, preferred_element_type=f32)
    o = g2 * jnp.einsum('bef,bfs->bes', hxT.astype(cd), convh.astype(cd),
                        preferred_element_type=f32) + hx
    return jnp.swapaxes(o, 1, 2)                 # (B, S, E)


if __name__ == "__main__":
    B, S, E = 2, 8, 32                            # batch, seq_len, emb_dim
    key = jax.random.PRNGKey(0)
    kx, k1, k2 = jax.random.split(key, 3)
    x = jax.random.normal(kx, (B, S, E), dtype=jnp.float32)
    w1 = jax.random.normal(k1, (S, S), dtype=jnp.float32)
    w2 = jax.random.normal(k2, (E, E), dtype=jnp.float32)
    # spectral_norm parametrization of the 1x1 conv weights (weight / sigma_max)
    w1 = w1 / jnp.linalg.norm(w1, ord=2)
    w2 = w2 / jnp.linalg.norm(w2, ord=2)
    # torch inits gamma to 0. (identity block); use small nonzero values so the
    # attention path is actually exercised.
    gammas = jnp.array([0.1, 0.2], dtype=jnp.float32)
    # TODO(synk): nn.Dropout(0.25) is identity in eval mode; training-mode dropout not implemented.

    # f32 MXU path (bit-parity oriented; recommended default for v5e).
    out_f32 = jax.block_until_ready(
        self_attention_module(x, w1, w2, gammas, compute_dtype=jnp.float32))
    ref_f32 = reference(x, w1, w2, gammas, compute_dtype=jnp.float32)
    assert out_f32.shape == (B, S, E)
    assert jnp.allclose(out_f32, ref_f32, atol=1e-3, rtol=1e-3), "f32 mismatch vs reference"

    # bf16-operand MXU path (default; v6e/v7x fast path), compared against a reference
    # that mirrors the same bf16 operand casts with f32 accumulation/residuals.
    out_bf16 = jax.block_until_ready(self_attention_module(x, w1, w2, gammas))
    ref_bf16 = reference(x, w1, w2, gammas, compute_dtype=jnp.bfloat16)
    assert out_bf16.shape == (B, S, E)
    assert jnp.allclose(out_bf16, ref_bf16, atol=5e-2, rtol=5e-2), "bf16 mismatch vs reference"

    print("KERNEL_OK")
</pallas_src>

<mosaic_0001>
module attributes {stable_mosaic.version = 11 : i64} {
  func.func @_sa_module_kernel(%arg0: i32, %arg1: memref<2xf32, #tpu.memory_space<smem>>, %arg2: memref<8x64xf32, #tpu.memory_space<vmem>>, %arg3: memref<8x8xf32, #tpu.memory_space<vmem>>, %arg4: memref<32x32xf32, #tpu.memory_space<vmem>>, %arg5: memref<8x64xf32, #tpu.memory_space<vmem>>) attributes {dimension_semantics = [#tpu.dimension_semantics<parallel>], iteration_bounds = array<i64: 1>, scalar_prefetch = 0 : i64, scratch_operands = 0 : i64, tpu.core_type = #tpu.core_type<tc>, window_params = [{transform_indices = @transform_0, window_bounds = array<i64: 2>}, {transform_indices = @transform_1, window_bounds = array<i64: 8, 64>}, {pipeline_mode = #tpu.pipeline_mode<synchronous>, transform_indices = @transform_2, window_bounds = array<i64: 8, 8>}, {pipeline_mode = #tpu.pipeline_mode<synchronous>, transform_indices = @transform_3, window_bounds = array<i64: 32, 32>}, {transform_indices = @transform_4, window_bounds = array<i64: 8, 64>}]} {
    %c0 = arith.constant 0 : index
    %0 = memref.load %arg1[%c0] : memref<2xf32, #tpu.memory_space<smem>>
    %c1 = arith.constant 1 : index
    %1 = memref.load %arg1[%c1] : memref<2xf32, #tpu.memory_space<smem>>
    %c0_0 = arith.constant 0 : index
    %c0_1 = arith.constant 0 : index
    %2 = vector.load %arg2[%c0_0, %c0_1] : memref<8x64xf32, #tpu.memory_space<vmem>>, vector<8x64xf32>
    %c0_2 = arith.constant 0 : index
    %c0_3 = arith.constant 0 : index
    %3 = vector.load %arg3[%c0_2, %c0_3] : memref<8x8xf32, #tpu.memory_space<vmem>>, vector<8x8xf32>
    %c0_4 = arith.constant 0 : index
    %c0_5 = arith.constant 0 : index
    %4 = vector.load %arg4[%c0_4, %c0_5] : memref<32x32xf32, #tpu.memory_space<vmem>>, vector<32x32xf32>
    %cst = arith.constant dense<0.000000e+00> : vector<8x64xf32>
    %5 = tpu.matmul %3, %2, %cst {dimension_numbers = #tpu.dot_dimension_numbers<[1], [0], [0], [1], [0, 0, 1, 1], [], []>} : vector<8x8xf32>, vector<8x64xf32>, vector<8x64xf32> -> vector<8x64xf32>
    %6 = vector.extract_strided_slice %2 {offsets = [0, 0], sizes = [8, 32], strides = [1, 1]} : vector<8x64xf32> to vector<8x32xf32>
    %7 = vector.extract_strided_slice %2 {offsets = [0, 0], sizes = [8, 32], strides = [1, 1]} : vector<8x64xf32> to vector<8x32xf32>
    %8 = tpu.transpose %6, [1, 0] : vector<8x32xf32> -> vector<32x8xf32>
    %cst_6 = arith.constant dense<0.000000e+00> : vector<8x8xf32>
    %9 = tpu.matmul %7, %8, %cst_6 {dimension_numbers = #tpu.dot_dimension_numbers<[1], [0], [0], [1], [0, 0, 1, 1], [], []>} : vector<8x32xf32>, vector<32x8xf32>, vector<8x8xf32> -> vector<8x8xf32>
    %10 = vector.extract_strided_slice %5 {offsets = [0, 0], sizes = [8, 32], strides = [1, 1]} : vector<8x64xf32> to vector<8x32xf32>
    %cst_7 = arith.constant dense<0.000000e+00> : vector<8x32xf32>
    %11 = tpu.matmul %9, %10, %cst_7 {dimension_numbers = #tpu.dot_dimension_numbers<[1], [0], [0], [1], [0, 0, 1, 1], [], []>} : vector<8x8xf32>, vector<8x32xf32>, vector<8x32xf32> -> vector<8x32xf32>
    %12 = vector.broadcast %0 : f32 to vector<8x32xf32>
    %13 = arith.mulf %12, %11 : vector<8x32xf32>
    %14 = arith.addf %13, %6 : vector<8x32xf32>
    %cst_8 = arith.constant dense<0.000000e+00> : vector<8x32xf32>
    %15 = tpu.matmul %14, %4, %cst_8 {dimension_numbers = #tpu.dot_dimension_numbers<[1], [0], [0], [1], [0, 0, 1, 1], [], []>} : vector<8x32xf32>, vector<32x32xf32>, vector<8x32xf32> -> vector<8x32xf32>
    %cst_9 = arith.constant dense<0.000000e+00> : vector<32x32xf32>
    %16 = tpu.matmul %8, %14, %cst_9 {dimension_numbers = #tpu.dot_dimension_numbers<[1], [0], [0], [1], [0, 0, 1, 1], [], []>} : vector<32x8xf32>, vector<8x32xf32>, vector<32x32xf32> -> vector<32x32xf32>
    %cst_10 = arith.constant dense<0.000000e+00> : vector<8x32xf32>
    %17 = tpu.matmul %15, %16, %cst_10 {dimension_numbers = #tpu.dot_dimension_numbers<[1], [0], [0], [1], [0, 0, 1, 1], [], []>} : vector<8x32xf32>, vector<32x32xf32>, vector<8x32xf32> -> vector<8x32xf32>
    %18 = vector.broadcast %1 : f32 to vector<8x32xf32>
    %19 = arith.mulf %18, %17 : vector<8x32xf32>
    %20 = arith.addf %19, %14 : vector<8x32xf32>
    %21 = vector.extract_strided_slice %2 {offsets = [0, 32], sizes = [8, 32], strides = [1, 1]} : vector<8x64xf32> to vector<8x32xf32>
    %22 = vector.extract_strided_slice %2 {offsets = [0, 32], sizes = [8, 32], strides = [1, 1]} : vector<8x64xf32> to vector<8x32xf32>
    %23 = tpu.transpose %21, [1, 0] : vector<8x32xf32> -> vector<32x8xf32>
    %cst_11 = arith.constant dense<0.000000e+00> : vector<8x8xf32>
    %24 = tpu.matmul %22, %23, %cst_11 {dimension_numbers = #tpu.dot_dimension_numbers<[1], [0], [0], [1], [0, 0, 1, 1], [], []>} : vector<8x32xf32>, vector<32x8xf32>, vector<8x8xf32> -> vector<8x8xf32>
    %25 = vector.extract_strided_slice %5 {offsets = [0, 32], sizes = [8, 32], strides = [1, 1]} : vector<8x64xf32> to vector<8x32xf32>
    %cst_12 = arith.constant dense<0.000000e+00> : vector<8x32xf32>
    %26 = tpu.matmul %24, %25, %cst_12 {dimension_numbers = #tpu.dot_dimension_numbers<[1], [0], [0], [1], [0, 0, 1, 1], [], []>} : vector<8x8xf32>, vector<8x32xf32>, vector<8x32xf32> -> vector<8x32xf32>
    %27 = vector.broadcast %0 : f32 to vector<8x32xf32>
    %28 = arith.mulf %27, %26 : vector<8x32xf32>
    %29 = arith.addf %28, %21 : vector<8x32xf32>
    %cst_13 = arith.constant dense<0.000000e+00> : vector<8x32xf32>
    %30 = tpu.matmul %29, %4, %cst_13 {dimension_numbers = #tpu.dot_dimension_numbers<[1], [0], [0], [1], [0, 0, 1, 1], [], []>} : vector<8x32xf32>, vector<32x32xf32>, vector<8x32xf32> -> vector<8x32xf32>
    %cst_14 = arith.constant dense<0.000000e+00> : vector<32x32xf32>
    %31 = tpu.matmul %23, %29, %cst_14 {dimension_numbers = #tpu.dot_dimension_numbers<[1], [0], [0], [1], [0, 0, 1, 1], [], []>} : vector<32x8xf32>, vector<8x32xf32>, vector<32x32xf32> -> vector<32x32xf32>
    %cst_15 = arith.constant dense<0.000000e+00> : vector<8x32xf32>
    %32 = tpu.matmul %30, %31, %cst_15 {dimension_numbers = #tpu.dot_dimension_numbers<[1], [0], [0], [1], [0, 0, 1, 1], [], []>} : vector<8x32xf32>, vector<32x32xf32>, vector<8x32xf32> -> vector<8x32xf32>
    %33 = vector.broadcast %1 : f32 to vector<8x32xf32>
    %34 = arith.mulf %33, %32 : vector<8x32xf32>
    %35 = arith.addf %34, %29 : vector<8x32xf32>
    %36 = tpu.concatenate %20, %35 in 1 : vector<8x32xf32>, vector<8x32xf32> -> vector<8x64xf32>
    %c0_16 = arith.constant 0 : index
    %c0_17 = arith.constant 0 : index
    %37 = vector.load %arg5[%c0_16, %c0_17] : memref<8x64xf32, #tpu.memory_space<vmem>>, vector<8x64xf32>
    tpu.vector_store %arg5[%c0_16, %c0_17], %36 {strides = array<i32>} : memref<8x64xf32, #tpu.memory_space<vmem>>, vector<8x64xf32>,
    return
  }
  func.func @transform_0(%arg0: i32) -> i32 {
    %c0_i32 = arith.constant 0 : i32
    %c0_i32_0 = arith.constant 0 : i32
    return %c0_i32 : i32
  }
  func.func @transform_1(%arg0: i32) -> (i32, i32) {
    %c0_i32 = arith.constant 0 : i32
    %c0_i32_0 = arith.constant 0 : i32
    return %c0_i32, %arg0 : i32, i32
  }
  func.func @transform_2(%arg0: i32) -> (i32, i32) {
    %c0_i32 = arith.constant 0 : i32
    %c0_i32_0 = arith.constant 0 : i32
    %c0_i32_1 = arith.constant 0 : i32
    return %c0_i32, %c0_i32_0 : i32, i32
  }
  func.func @transform_3(%arg0: i32) -> (i32, i32) {
    %c0_i32 = arith.constant 0 : i32
    %c0_i32_0 = arith.constant 0 : i32
    %c0_i32_1 = arith.constant 0 : i32
    return %c0_i32, %c0_i32_0 : i32, i32
  }
  func.func @transform_4(%arg0: i32) -> (i32, i32) {
    %c0_i32 = arith.constant 0 : i32
    %c0_i32_0 = arith.constant 0 : i32
    return %c0_i32, %arg0 : i32, i32
  }
}

</mosaic_0001>

<bundles_post_ra>
// kernel: tpu_custom_call.1
= control target key start
LH: loop header
LB: loop body
LE: loop exit
PB: predicated region body
PF: predicated region fallthrough
CT: control target
= control target key end

     0   :  { %9 = vsyncpa [#allocation5], 0  ;;  %s1508_s0 = inlined_call_operand.hbm [shape: f32[2], index: 0, kind: input, shape index: {}]   ;;  %s1509_s1 = inlined_call_operand.hbm [shape: f32[8,64], index: 1, kind: input, shape index: {}]   ;;  %s1510_s2 = inlined_call_operand.hbm [shape: f32[8,8], index: 2, kind: input, shape index: {}]   ;;  %s1511_s3 = inlined_call_operand.hbm [shape: f32[32,32], index: 3, kind: input, shape index: {}]   ;;  %s1512_s4 = inlined_call_operand.hbm [shape: f32[8,64], index: 4, kind: output, shape index: {}]  }
   0x1   :  { %10 = vsyncpa [#allocation3], 0 }
   0x2   :  { %11 = vsyncpa [#allocation8], 0 }
   0x3   :  { %12 = vsyncpa [#allocation4], 0  ;;  %s1346_s15 = smov [#allocation7]   ;;  %s1347_s17 = smov [#allocation6]  }
   0x4   :  { %s37_s16 = sshll.u32 %s1346_s15, 4  ;;  %s27_s18 = sshll.u32 %s1347_s17, 4  ;;  %s38_s16 = int_to_ptr.vmem [resolvable:$true] %s37_s16  ;;  %s28_s18 = int_to_ptr.vmem [resolvable:$true] %s27_s18 }
   0x5   :  { %s1240_s21 = scalar_lea.hbm %s1510_s2, 128 }
   0x6   :  { %p1241_p0 = scmp.ne.s32.totalorder %s1510_s2, %s1240_s21  ;;  %p1244_p1 = scmp.lt.u32.totalorder %s1240_s21, %s1510_s2 }
   0x8   :  { %p1246_p2 = pnand %p1244_p1, %p1241_p0 }
   0xa   :  { %1249 = shalt.err (!%p1246_p2)
}
   0xb   :  { %s1250_s26 = scalar_lea.vmem %s38_s16, 128  ;;  %p1255_p4 = scmp.lt.s32.totalorder %s38_s16, %s38_s16 }
   0xc   :  { %p1251_p3 = scmp.ne.s32.totalorder %s38_s16, %s1250_s26  ;;  %p1256_p5 = scmp.lt.s32.totalorder %s1250_s26, %s1250_s26 }
   0xe   :  { %p1257_p6 = por %p1256_p5, %p1255_p4 }
  0x10   :  { %p1258_p7 = pnand %p1257_p6, %p1251_p3 }
  0x12   :  { %1261 = shalt.err (!%p1258_p7)
}
  0x13   :  { %40 = dma.hbm_to_vmem [thread:$0]  %s1510_s2, 128, %s38_s16, [#allocation8]  }
  0x14   :  { %s1262_s5 = scalar_lea.hbm %s1508_s0, 16 }
  0x15   :  { %p1263_p8 = scmp.ne.s32.totalorder %s1508_s0, %s1262_s5  ;;  %p1266_p9 = scmp.lt.u32.totalorder %s1262_s5, %s1508_s0 }
  0x17   :  { %p1268_p10 = pnand %p1266_p9, %p1263_p8 }
  0x19   :  { %1271 = shalt.err (!%p1268_p10)
}
  0x1a   :  { %s1348_s10 = smov [#allocation2]   ;;  %s1272_s14 = scalar_lea.hbm %s1509_s1, 128 }
  0x1b   :  { %20 = dma.hbm_to_smem %s1508_s0, 16, %s1348_s10, [#allocation5]  }
  0x1c   :  { %p1273_p11 = scmp.ne.s32.totalorder %s1509_s1, %s1272_s14  ;;  %p1276_p12 = scmp.lt.u32.totalorder %s1272_s14, %s1509_s1 }
  0x1e   :  { %p1278_p13 = pnand %p1276_p12, %p1273_p11 }
  0x20   :  { %1281 = shalt.err (!%p1278_p13)
}
  0x21   :  { %s1282_s20 = scalar_lea.vmem %s28_s18, 128  ;;  %p1287_p1 = scmp.lt.s32.totalorder %s28_s18, %s28_s18 }
  0x22   :  { %p1283_p0 = scmp.ne.s32.totalorder %s28_s18, %s1282_s20  ;;  %p1288_p2 = scmp.lt.s32.totalorder %s1282_s20, %s1282_s20 }
  0x24   :  { %p1289_p3 = por %p1288_p2, %p1287_p1 }
  0x26   :  { %p1290_p4 = pnand %p1289_p3, %p1283_p0 }
  0x28   :  { %1293 = shalt.err (!%p1290_p4)
}
  0x29   :  { %30 = dma.hbm_to_vmem [thread:$0]  %s1509_s1, 128, %s28_s18, [#allocation3]  }
  0x2a   :  { %s1349_s22 = smov [#allocation9]   ;;  %s1294_s26 = scalar_lea.hbm %s1511_s3, 512 }
  0x2b   :  { %s46_s23 = sshll.u32 %s1349_s22, 4  ;;  %p1295_p5 = scmp.ne.s32.totalorder %s1511_s3, %s1294_s26  ;;  %s47_s23 = int_to_ptr.vmem [resolvable:$true] %s46_s23 }
  0x2c   :  { %p1298_p6 = scmp.lt.u32.totalorder %s1294_s26, %s1511_s3 }
  0x2e   :  { %p1300_p7 = pnand %p1298_p6, %p1295_p5 }
  0x30   :  { %1303 = shalt.err (!%p1300_p7)
}
  0x31   :  { %s1304_s5 = scalar_lea.vmem %s47_s23, 512  ;;  %p1309_p9 = scmp.lt.s32.totalorder %s47_s23, %s47_s23 }
  0x32   :  { %p1305_p8 = scmp.ne.s32.totalorder %s47_s23, %s1304_s5  ;;  %p1310_p10 = scmp.lt.s32.totalorder %s1304_s5, %s1304_s5 }
  0x34   :  { %p1311_p11 = por %p1310_p10, %p1309_p9 }
  0x36   :  { %p1312_p12 = pnand %p1311_p11, %p1305_p8 }
  0x38   :  { %1315 = shalt.err (!%p1312_p12)
}
  0x39   :  { %s1350_s1 = smov 128   ;;  %s1351_s18 = smov 8  }
  0x3a   :  { %52 = dma.hbm_to_vmem [thread:$0]  %s1511_s3, 512, %s47_s23, [#allocation8], %s1350_s1, %s1350_s1, %s1351_s18  }
  0x3b   :  { %1338 = dma.done.wait [#allocation5], 16  }
  0x3c   :  { %1339 = vsyncadd [#allocation5], 4294967280 }
  0x3d   :  { %1340 = dma.done.wait [#allocation3], 128  }
  0x3e   :  { %1341 = vsyncadd [#allocation3], 4294967168 }
  0x3f   :  { %1342 = dma.done.wait [#allocation8], 640  }
  0x40   :  { %1343 = vsyncadd [#allocation8], 4294966656 }
  0x41   :  { %65 = sfence }
  0x42   :  { %v68_v0 = vld [vmem:[#allocation6] sm:$0xff]  ;;  %v1352_v1 = vmov 0.0|0.0   ;;  %v1353_v2 = vmov 0.0   ;;  %vm1354_vm0 = vmmov 0   ;;  %v69_v3 = vld [vmem:[#allocation7] sm:$0xff]  ;;  %vm74_vm1 = vcmask 64512  }
  0x43   :  { %148 = vxpose.xlu0.b32.start.end [1/1] (short) (narrow) %v68_v0, 32  ;;  %1192 = vmatprep.subr.bf16.mxu1 %v1352_v1  ;;  %s1355_s3 = smov 96   ;;  %vm180_vm2 = vcmask 261120   ;;  %v70_v13 = vld [vmem:[#allocation9] sm:$0xff]  ;;  %v71_v14 = vld [vmem:[#allocation9 + $0x8] sm:$0xff]  ;;  %v72_v18 = vld [vmem:[#allocation9 + $0x10] sm:$0xff] }
  0x44   :  { %1095 = vmatprep.subr.mxu0 %v1353_v2  ;;  %1097 = vmatprep.mubr.msk.f32.mxu0 %vm1354_vm0, %v1353_v2  ;;  %v1199_v15 = vpack.c.bf16 %v71_v14, %v70_v13  ;;  %v73_v19 = vld [vmem:[#allocation9 + $0x18] sm:$0xff]  ;;  %s1454_s8 = sld [smem:[#allocation2]]  ;;  %s1031_s9 = sld [smem:[#allocation2 + $0x1]]  ;;  %vm1012_vm3 = vcmask 523264  }
  0x45   :  { %1096 = vmatpush3.msra.mxu0 %v68_v0  ;;  %1108 = vmatprep.mubr.msk.f32.mxu1 %vm1354_vm0, %v1353_v2  ;;  %v1202_v20 = vpack.c.bf16 %v73_v19, %v72_v18  ;;  %s1356_s10 = smov 32   ;;  %s1357_s11 = smov [#allocation10]  }
  0x46   :  { %1098 = vmatmul.mubr.msk.f32.vlgmr.msra.gmra.mrb[0].mxu0 %vm74_vm1, %v69_v3  ;;  %1111 = vmatprep.subr.mxu0 %v1353_v2  ;;  %s1020_s12 = sshll.u32 %s1357_s11, 4  ;;  %s1021_s12 = int_to_ptr.vmem [resolvable:$true] %s1020_s12 }
  0x47   :  { %1113 = vmatprep.mubr.msk.f32.mxu0 %vm1354_vm0, %v1353_v2  ;;  %s1316_s2 = scalar_lea.vmem %s1021_s12, 128  ;;  %p1321_p0 = scmp.lt.s32.totalorder %s1021_s12, %s1021_s12 }
  0x48   :  { %p1317_p13 = scmp.ne.s32.totalorder %s1021_s12, %s1316_s2  ;;  %p1322_p1 = scmp.lt.s32.totalorder %s1316_s2, %s1316_s2 }
  0x4a   :  { %v327_v23 = vstv %s1454_s8  ;;  %v573_v57 = vstv %s1031_s9  ;;  %p1323_p2 = por %p1322_p1, %p1321_p0 }
  0x4c   :  { %p1324_p3 = pnand %p1323_p2, %p1317_p13 }
  0x78   :  { %576 = vrot.lane.b32.xlu0 %v68_v0, %s1355_s3 }
  0xc3   :  { %v164_v4 = vpop.trf.xlu0 }
  0xc7   :  { %v165_v5 = vpop.trf.xlu0 }
  0xc8   :  { %v1193_v6 = vpack.c.bf16 %v165_v5, %v164_v4 }
  0xca   :  { %1194 = vmatpush3.bf16.msra.mxu1 %v1193_v6 }
  0xcb   :  { %v166_v7 = vpop.trf.xlu0  ;;  %1195 = vmatprep.subr.bf16.mxu1 %v1352_v1 }
  0xcf   :  { %v167_v8 = vpop.trf.xlu0 }
  0xd0   :  { %v1196_v9 = vpack.c.bf16 %v167_v8, %v166_v7 }
  0xd2   :  { %1197 = vmatpush3.bf16.msra.mxu1 %v1196_v9 }
  0xd3   :  { %1204 = vmatprep.subr.bf16.mxu1 %v1352_v1 }
  0xd5   :  { %1109 = vmatmul.mubr.msk.f32.vlgmr.msra.gmra.mrb[0].mxu1 %vm180_vm2, %v68_v0 }
  0xd6   :  { %1143 = vmatprep.mubr.msk.f32.mxu1 %vm1354_vm0, %v1353_v2 }
  0xea   :  { %v1446_v10 = vpop.permute.xlu0 %576 }
  0xeb   :  { %579 = vxpose.xlu1.b32.start.end [1/1] (short) (narrow) %v1446_v10, 32 }
 0x119   :  { %v144_v11 = vpop.f32.mrb[0].mxu0 }
 0x11a   :  { %v1099_v12 = vpop.f32.mrb[1].mxu0  ;;  %684 = vrot.lane.b32.xlu1 %v144_v11, %s1355_s3  ;;  %1112 = vmatpush3.msra.mxu0 %v144_v11 }
 0x11b   :  { %1198 = vmatprep.subr.bf16.mxu0 %v1352_v1 }
 0x16b   :  { %v595_v21 = vpop.trf.xlu1 }
 0x16f   :  { %v596_v22 = vpop.trf.xlu1 }
 0x170   :  { %v1211_v29 = vpack.c.bf16 %v596_v22, %v595_v21 }
 0x173   :  { %v597_v27 = vpop.trf.xlu1 }
 0x177   :  { %v598_v30 = vpop.trf.xlu1 }
 0x178   :  { %v1214_v31 = vpack.c.bf16 %v598_v30, %v597_v27 }
 0x18c   :  { %v685_v42 = vpop.permute.xlu1 %684 }
 0x1a8   :  { %v250_v16 = vpop.f32.mrb[0].mxu1 }
 0x1a9   :  { %v1110_v17 = vpop.f32.mrb[1].mxu1  ;;  %1114 = vmatmul.mubr.msk.f32.vlgmr.msra.gmra.mrb[2].mxu0 %vm74_vm1, %v250_v16 }
 0x1aa   :  { %1200 = vmatpush3.bf16.msra.mxu0 %v1199_v15  ;;  %1124 = vmatprep.mubr.msk.f32.mxu0 %vm1354_vm0, %v1353_v2 }
 0x1ab   :  { %1201 = vmatprep.subr.bf16.mxu0 %v1352_v1 }
 0x1ae   :  { %1203 = vmatpush3.bf16.msra.mxu0 %v1202_v20 }
 0x27c   :  { %v323_v24 = vpop.f32.mrb[2].mxu0 }
 0x27d   :  { %v328_v25 = vmul.f32 %v327_v23, %v323_v24  ;;  %v1115_v26 = vpop.f32.mrb[3].mxu0 }
 0x27f   :  { %v1457_v28 = vadd.f32 %v328_v25, %v68_v0 }
 0x281   :  { %1125 = vmatmul.mubr.msk.f32.vlgmr.msra.gmra.mrb[4].mxu0 %vm180_vm2, %v1457_v28  ;;  %1127 = vmatprep.subr.mxu0 %v1457_v28 }
 0x282   :  { %1128 = vmatpush3.msra.mxu0 %v1457_v28  ;;  %1129 = vmatprep.mubr.msk.f32.mxu0 %vm74_vm1, %v164_v4 }
 0x283   :  { %1210 = vmatprep.subr.bf16.mxu0 %v1352_v1 }
 0x285   :  { %1130 = vmatmul.mubr.msk.f32.vlgmr.msra.gmra.mrb[6].mxu0 %vm74_vm1, %v165_v5 }
 0x286   :  { %1212 = vmatpush3.bf16.msra.mxu0 %v1211_v29  ;;  %1132 = vmatprep.mubr.msk.f32.mxu0 %vm74_vm1, %v166_v7 }
 0x287   :  { %1213 = vmatprep.subr.bf16.mxu0 %v1352_v1 }
 0x289   :  { %1133 = vmatmul.mubr.msk.f32.gmra.mrb[8].mxu0 %vm74_vm1, %v167_v8 }
 0x28a   :  { %1215 = vmatpush3.bf16.msra.mxu0 %v1214_v31  ;;  %1154 = vmatprep.mubr.msk.f32.mxu0 %vm1354_vm0, %v1353_v2 }
 0x28b   :  { %1216 = vmatprep.subr.bf16.mxu0 %v1352_v1 }
 0x28d   :  { %1155 = vmatmul.mubr.msk.f32.vlgmr.msra.gmra.mrb[10].mxu0 %vm180_vm2, %v1446_v10 }
 0x28e   :  { %1218 = vmatpush3.bf16.msra.mxu0 %v1199_v15  ;;  %1170 = vmatprep.mubr.msk.f32.mxu0 %vm1354_vm0, %v1353_v2 }
 0x28f   :  { %1219 = vmatprep.subr.bf16.mxu0 %v1352_v1 }
 0x292   :  { %1221 = vmatpush3.bf16.msra.mxu0 %v1202_v20 }
 0x354   :  { %v399_v32 = vpop.f32.mrb[4].mxu0 }
 0x355   :  { %v1126_v33 = vpop.f32.mrb[5].mxu0 }
 0x358   :  { %v1131_v34 = vpop.f32.mrb[6].mxu0 }
 0x359   :  { %v481_v35 = vpop.f32.mrb[7].mxu0 }
 0x35a   :  { %v1205_v36 = vpack.c.bf16 %v1131_v34, %v481_v35 }
 0x35c   :  { %v1134_v37 = vpop.f32.mrb[8].mxu0  ;;  %1206 = vmatpush3.bf16.msra.mxu1 %v1205_v36 }
 0x35d   :  { %v491_v38 = vpop.f32.mrb[9].mxu0  ;;  %1207 = vmatprep.subr.bf16.mxu1 %v1352_v1 }
 0x35e   :  { %v1208_v39 = vpack.c.bf16 %v1134_v37, %v491_v38 }
 0x360   :  { %1209 = vmatpush3.bf16.msra.mxu1 %v1208_v39  ;;  %v679_v40 = vpop.f32.mrb[10].mxu0 }
 0x361   :  { %v1156_v41 = vpop.f32.mrb[11].mxu0  ;;  %1157 = vmatprep.subr.mxu1 %v1353_v2 }
 0x363   :  { %1144 = vmatmul.mubr.msk.f32.vlgmr.msra.gmra.mrb[2].mxu1 %vm180_vm2, %v399_v32 }
 0x364   :  { %1158 = vmatpush3.msra.mxu1 %v685_v42  ;;  %1159 = vmatprep.mubr.msk.f32.mxu1 %vm1354_vm0, %v1353_v2 }
 0x367   :  { %1160 = vmatmul.mubr.msk.f32.vlgmr.msra.gmra.mrb[4].mxu1 %vm74_vm1, %v679_v40 }
 0x368   :  { %1175 = vmatprep.mubr.msk.f32.mxu1 %vm74_vm1, %v595_v21 }
 0x436   :  { %v569_v43 = vpop.f32.mrb[2].mxu1 }
 0x437   :  { %v1145_v44 = vpop.f32.mrb[3].mxu1  ;;  %v574_v62 = vmul.f32 %v573_v57, %v569_v43 }
 0x439   :  { %v575_v63 = vadd.f32 %v574_v62, %v1457_v28 }
 0x43a   :  { %v756_v45 = vpop.f32.mrb[4].mxu1 }
 0x43b   :  { %v760_v46 = vmul.f32 %v756_v45, %v327_v23  ;;  %v1161_v47 = vpop.f32.mrb[5].mxu1 }
 0x43d   :  { %v761_v48 = vadd.f32 %v760_v46, %v1446_v10 }
 0x43f   :  { %1171 = vmatmul.mubr.msk.f32.vlgmr.msra.gmra.mrb[12].mxu0 %vm180_vm2, %v761_v48  ;;  %1173 = vmatprep.subr.mxu1 %v761_v48 }
 0x440   :  { %1174 = vmatpush3.msra.mxu1 %v761_v48 }
 0x441   :  { %1176 = vmatmul.mubr.msk.f32.vlgmr.msra.gmra.mrb[6].mxu1 %vm74_vm1, %v596_v22  ;;  %1222 = vmatprep.subr.bf16.mxu1 %v1352_v1 }
 0x442   :  { %1178 = vmatprep.mubr.msk.f32.mxu1 %vm74_vm1, %v597_v27 }
 0x445   :  { %1179 = vmatmul.mubr.msk.f32.gmra.mrb[8].mxu1 %vm74_vm1, %v598_v30 }
 0x446   :  { %1189 = vmatprep.mubr.msk.f32.mxu1 %vm1354_vm0, %v1353_v2 }
 0x512   :  { %v831_v49 = vpop.f32.mrb[12].mxu0 }
 0x513   :  { %v1172_v50 = vpop.f32.mrb[13].mxu0 }
 0x514   :  { %v1177_v51 = vpop.f32.mrb[6].mxu1 }
 0x515   :  { %v913_v52 = vpop.f32.mrb[7].mxu1 }
 0x516   :  { %v1223_v53 = vpack.c.bf16 %v1177_v51, %v913_v52 }
 0x518   :  { %v1180_v54 = vpop.f32.mrb[8].mxu1  ;;  %1224 = vmatpush3.bf16.msra.mxu1 %v1223_v53 }
 0x519   :  { %v923_v55 = vpop.f32.mrb[9].mxu1  ;;  %1225 = vmatprep.subr.bf16.mxu1 %v1352_v1 }
 0x51a   :  { %v1226_v56 = vpack.c.bf16 %v1180_v54, %v923_v55 }
 0x51c   :  { %1227 = vmatpush3.bf16.msra.mxu1 %v1226_v56 }
 0x51f   :  { %1190 = vmatmul.mubr.msk.f32.vlgmr.msra.gmra.mrb[10].mxu1 %vm180_vm2, %v831_v49 }
 0x5f2   :  { %v1001_v58 = vpop.f32.mrb[10].mxu1 }
 0x5f3   :  { %v1005_v59 = vmul.f32 %v1001_v58, %v573_v57  ;;  %v1191_v60 = vpop.f32.mrb[11].mxu1 }
 0x5f5   :  { %v1006_v61 = vadd.f32 %v1005_v59, %v761_v48 }
 0x5f7   :  { %1008 = vrot.lane.b32.xlu1 %v1006_v61, %s1356_s10 }
 0x669   :  { %v1009_v0 = vpop.permute.xlu1 %1008 }
 0x66a   :  { %v1011_v1 = vsel %vm180_vm2, %v575_v63, %v1009_v0 }
 0x66b   :  { %1013 = vst.msk [vmem:[#allocation10] sm:$0xff] %vm1012_vm3, %v1011_v1 }
 0x66c   :  { %1327 = shalt.err (!%p1324_p3)
}
 0x66d   :  { %s1328_s15 = scalar_lea.hbm %s1512_s4, 128 }
 0x66e   :  { %p1329_p4 = scmp.ne.s32.totalorder %s1512_s4, %s1328_s15  ;;  %p1332_p5 = scmp.lt.u32.totalorder %s1328_s15, %s1512_s4 }
 0x670   :  { %p1334_p6 = pnand %p1332_p5, %p1329_p4 }
 0x672   :  { %1337 = shalt.err (!%p1334_p6)
}
 0x673   :  { %1023 = dma.vmem_to_hbm [thread:$0]  %s1021_s12, 128, %s1512_s4, [#allocation4]  }
 0x674   :  { %1344 = dma.done.wait [#allocation4], 128  }
 0x675   :  { %1345 = vsyncadd [#allocation4], 4294967168 }
 0x676   :  { %1027 = vsyncpa [#allocation3], 1 }
 0x677   :  { %1028 = vsyncpa [#allocation8], 1 }
 0x678   :  { %1029 = vsyncpa [#allocation4], 1 }
 0x679   :  { %1030 = vsyncpa [#allocation5], 1 }

</bundles_post_ra>
